<compile_context>
chip_gen: v6e
topology: v6e:2x2x1
jax: 0.10.0
libtpu: 0.0.40
codegen_flags: <defaults>
</compile_context>

<pallas_src>
import jax
import jax.numpy as jnp
from jax.experimental import pallas as pl
from jax.experimental.pallas import tpu as pltpu


LANE = 128      # TPU lane width: lane-dense output avoids masked vst + ragged DMA
SUBLANE = 8     # f32 sublane tile


def _round_up(n: int, m: int) -> int:
    return ((n + m - 1) // m) * m


def vnet_kernel(x_ref, w1t_ref, b1_ref, w2t_ref, b2_ref, o_ref):
    # linear1: [TB, IN] @ [IN, H] on the MXU (f32 accumulate) + bias, ReLU.
    h = jnp.dot(x_ref[...], w1t_ref[...], preferred_element_type=jnp.float32)
    h = jnp.maximum(h + b1_ref[...], 0.0)
    # linear2: [TB, H] @ [H, OUTP] + bias   (OUTP = OUT padded to 128 lanes).
    z = jnp.dot(h, w2t_ref[...], preferred_element_type=jnp.float32) + b2_ref[...]
    # sigmoid = 1 / (1 + exp(-z)); exp and approx reciprocal both run on the
    # EUP slot, leaving the VPU free.
    o_ref[...] = pl.reciprocal(1.0 + jnp.exp(-z), approx=True).astype(o_ref.dtype)


def prepare_vnet_params(w1, b1, w2, b2):
    """One-time layout prep, hoisted out of the per-forward path.

    w1: [H, IN], b1: [H], w2: [OUT, H], b2: [OUT]  (PyTorch nn.Linear layout).
    Returns (w1t [IN, H], b1 [1, H], w2t [H, OUTP], b2 [1, OUTP]) with the OUT
    dimension zero-padded to a multiple of 128 lanes (padded logits are 0 ->
    sigmoid 0.5, sliced away by the caller / ignored by a fused consumer).
    """
    h, _ = w1.shape
    out_features = w2.shape[0]
    outp = _round_up(out_features, LANE)
    pad = outp - out_features
    w1t = jnp.transpose(w1)                                      # [IN, H]
    b1r = b1.reshape(1, h)                                       # [1, H]
    w2t = jnp.pad(jnp.transpose(w2), ((0, 0), (0, pad)))         # [H, OUTP]
    b2r = jnp.pad(b2.reshape(1, out_features), ((0, 0), (0, pad)))
    return w1t, b1r, w2t, b2r


def vnet_forward_padded(x, params, *, block_b=512):
    """Runs the kernel; returns the lane-padded [Bp, OUTP] output slab."""
    w1t, b1r, w2t, b2r = params
    b, in_features = x.shape
    h = w1t.shape[1]
    outp = w2t.shape[1]

    # Batch tile: multiple of 8 sublanes; block_b >= 512 approaches the HBM
    # roofline for large B, while tiny demo batches collapse to few tiles.
    tb = min(_round_up(block_b, SUBLANE), _round_up(b, SUBLANE))
    bp = _round_up(b, tb)
    if bp != b:
        x = jnp.pad(x, ((0, bp - b), (0, 0)))

    grid = (bp // tb,)

    # VMEM budget: double-buffered streamed x/out tiles + (also double-buffered,
    # tiny) resident params, generous slack; well under v7x's 64 MiB.
    need = 4 * (2 * tb * in_features + 2 * tb * outp
                + 2 * (in_features * h + h * outp + h + outp))
    vmem_limit = int(min(max(4 * need, 8 * 1024 * 1024), 32 * 1024 * 1024))

    # Note: last-two dims IN / H of the x / weight blocks are legal only
    # because each equals the full array extent; any future tiling of IN or H
    # must pad them to (8, 128) multiples.
    return pl.pallas_call(
        vnet_kernel,
        out_shape=jax.ShapeDtypeStruct((bp, outp), x.dtype),
        grid=grid,
        in_specs=[
            pl.BlockSpec((tb, in_features), lambda i: (i, 0)),   # streamed x
            pl.BlockSpec((in_features, h), lambda i: (0, 0)),    # resident W1^T
            pl.BlockSpec((1, h), lambda i: (0, 0)),              # resident b1
            pl.BlockSpec((h, outp), lambda i: (0, 0)),           # resident W2^T (padded)
            pl.BlockSpec((1, outp), lambda i: (0, 0)),           # resident b2 (padded)
        ],
        out_specs=pl.BlockSpec((tb, outp), lambda i: (i, 0)),    # lane-dense out
        compiler_params=pltpu.CompilerParams(
            dimension_semantics=("parallel",),   # shard batch tiles across v7x's 2 TCs
            vmem_limit_bytes=vmem_limit,
        ),
    )(x, w1t, b1r, w2t, b2r)


def vnet_forward(x, params, out_features, *, block_b=512):
    """[B, IN] -> [B, OUT]; sigmoid(relu(x @ W1^T + b1) @ W2^T + b2)."""
    y = vnet_forward_padded(x, params, block_b=block_b)
    # TODO(synk): in production, fuse the consumer of these per-sample weights
    # so the lane-dense slab never round-trips HBM; this slice is demo glue.
    return y[: x.shape[0], :out_features]


def init_linear_params(key, in_features, out_features):
    """nn.Linear-style uniform(-1/sqrt(in), 1/sqrt(in)) init."""
    kw, kb = jax.random.split(key)
    bound = 1.0 / jnp.sqrt(jnp.float32(in_features))
    w = jax.random.uniform(kw, (out_features, in_features),
                           minval=-bound, maxval=bound, dtype=jnp.float32)
    b = jax.random.uniform(kb, (out_features,),
                           minval=-bound, maxval=bound, dtype=jnp.float32)
    return w, b


if __name__ == "__main__":
    # input=16, hidden=32, output=4; batch chosen so the demo exercises a
    # multi-step, pipelined batch grid (block_b=8 -> 4 tiles) plus row padding.
    B, IN, HID, OUT = 30, 16, 32, 4

    key = jax.random.PRNGKey(0)
    kx, k1, k2 = jax.random.split(key, 3)
    x = jax.random.normal(kx, (B, IN), dtype=jnp.float32)
    w1, b1 = init_linear_params(k1, IN, HID)
    w2, b2 = init_linear_params(k2, HID, OUT)

    params = prepare_vnet_params(w1, b1, w2, b2)   # transposes/padding hoisted

    out = vnet_forward(x, params, OUT, block_b=8)
    out = jax.block_until_ready(out)

    # Pure-JAX reference (same semantics as the PyTorch forward).
    ref = jax.nn.sigmoid(jnp.maximum(x @ w1.T + b1, 0.0) @ w2.T + b2)
    assert out.shape == (B, OUT)
    max_err = float(jnp.max(jnp.abs(out - ref)))
    assert jnp.allclose(out, ref, atol=2e-3, rtol=2e-3), f"max abs err {max_err}"

    print("KERNEL_OK")
</pallas_src>

<mosaic_0001>
module attributes {stable_mosaic.version = 11 : i64} {
  func.func @vnet_kernel(%arg0: i32, %arg1: memref<8x16xf32, #tpu.memory_space<vmem>>, %arg2: memref<16x32xf32, #tpu.memory_space<vmem>>, %arg3: memref<1x32xf32, #tpu.memory_space<vmem>>, %arg4: memref<32x128xf32, #tpu.memory_space<vmem>>, %arg5: memref<1x128xf32, #tpu.memory_space<vmem>>, %arg6: memref<8x128xf32, #tpu.memory_space<vmem>>) attributes {dimension_semantics = [#tpu.dimension_semantics<parallel>], iteration_bounds = array<i64: 4>, scalar_prefetch = 0 : i64, scratch_operands = 0 : i64, tpu.core_type = #tpu.core_type<tc>, window_params = [{transform_indices = @transform_0, window_bounds = array<i64: 8, 16>}, {pipeline_mode = #tpu.pipeline_mode<synchronous>, transform_indices = @transform_1, window_bounds = array<i64: 16, 32>}, {pipeline_mode = #tpu.pipeline_mode<synchronous>, transform_indices = @transform_2, window_bounds = array<i64: 1, 32>}, {pipeline_mode = #tpu.pipeline_mode<synchronous>, transform_indices = @transform_3, window_bounds = array<i64: 32, 128>}, {pipeline_mode = #tpu.pipeline_mode<synchronous>, transform_indices = @transform_4, window_bounds = array<i64: 1, 128>}, {transform_indices = @transform_5, window_bounds = array<i64: 8, 128>}]} {
    %c0 = arith.constant 0 : index
    %c0_0 = arith.constant 0 : index
    %0 = vector.load %arg1[%c0, %c0_0] : memref<8x16xf32, #tpu.memory_space<vmem>>, vector<8x16xf32>
    %c0_1 = arith.constant 0 : index
    %c0_2 = arith.constant 0 : index
    %1 = vector.load %arg2[%c0_1, %c0_2] : memref<16x32xf32, #tpu.memory_space<vmem>>, vector<16x32xf32>
    %cst = arith.constant dense<0.000000e+00> : vector<8x32xf32>
    %2 = tpu.matmul %0, %1, %cst {dimension_numbers = #tpu.dot_dimension_numbers<[1], [0], [0], [1], [0, 0, 1, 1], [], []>} : vector<8x16xf32>, vector<16x32xf32>, vector<8x32xf32> -> vector<8x32xf32>
    %c0_3 = arith.constant 0 : index
    %c0_4 = arith.constant 0 : index
    %3 = vector.load %arg3[%c0_3, %c0_4] : memref<1x32xf32, #tpu.memory_space<vmem>>, vector<1x32xf32>
    %4 = vector.broadcast %3 : vector<1x32xf32> to vector<8x32xf32>
    %5 = arith.addf %2, %4 : vector<8x32xf32>
    %cst_5 = arith.constant 0.000000e+00 : f32
    %6 = vector.broadcast %cst_5 : f32 to vector<8x32xf32>
    %7 = arith.maximumf %5, %6 : vector<8x32xf32>
    %c0_6 = arith.constant 0 : index
    %c0_7 = arith.constant 0 : index
    %8 = vector.load %arg4[%c0_6, %c0_7] : memref<32x128xf32, #tpu.memory_space<vmem>>, vector<32x128xf32>
    %cst_8 = arith.constant dense<0.000000e+00> : vector<8x128xf32>
    %9 = tpu.matmul %7, %8, %cst_8 {dimension_numbers = #tpu.dot_dimension_numbers<[1], [0], [0], [1], [0, 0, 1, 1], [], []>} : vector<8x32xf32>, vector<32x128xf32>, vector<8x128xf32> -> vector<8x128xf32>
    %c0_9 = arith.constant 0 : index
    %c0_10 = arith.constant 0 : index
    %10 = vector.load %arg5[%c0_9, %c0_10] : memref<1x128xf32, #tpu.memory_space<vmem>>, vector<1x128xf32>
    %11 = vector.broadcast %10 : vector<1x128xf32> to vector<8x128xf32>
    %12 = arith.addf %9, %11 : vector<8x128xf32>
    %cst_11 = arith.constant 0.000000e+00 : f32
    %13 = vector.broadcast %cst_11 : f32 to vector<8x128xf32>
    %14 = arith.subf %13, %12 : vector<8x128xf32>
    %15 = math.exp %14 : vector<8x128xf32>
    %cst_12 = arith.constant 1.000000e+00 : f32
    %16 = vector.broadcast %cst_12 : f32 to vector<8x128xf32>
    %17 = arith.addf %16, %15 : vector<8x128xf32>
    %18 = tpu.reciprocal %17 {approx = true} : vector<8x128xf32> -> vector<8x128xf32>
    %c0_13 = arith.constant 0 : index
    %c0_14 = arith.constant 0 : index
    %19 = vector.load %arg6[%c0_13, %c0_14] : memref<8x128xf32, #tpu.memory_space<vmem>>, vector<8x128xf32>
    tpu.vector_store %arg6[%c0_13, %c0_14], %18 {strides = array<i32>} : memref<8x128xf32, #tpu.memory_space<vmem>>, vector<8x128xf32>,
    return
  }
  func.func @transform_0(%arg0: i32) -> (i32, i32) {
    %c0_i32 = arith.constant 0 : i32
    %c0_i32_0 = arith.constant 0 : i32
    return %arg0, %c0_i32 : i32, i32
  }
  func.func @transform_1(%arg0: i32) -> (i32, i32) {
    %c0_i32 = arith.constant 0 : i32
    %c0_i32_0 = arith.constant 0 : i32
    %c0_i32_1 = arith.constant 0 : i32
    return %c0_i32, %c0_i32_0 : i32, i32
  }
  func.func @transform_2(%arg0: i32) -> (i32, i32) {
    %c0_i32 = arith.constant 0 : i32
    %c0_i32_0 = arith.constant 0 : i32
    %c0_i32_1 = arith.constant 0 : i32
    return %c0_i32, %c0_i32_0 : i32, i32
  }
  func.func @transform_3(%arg0: i32) -> (i32, i32) {
    %c0_i32 = arith.constant 0 : i32
    %c0_i32_0 = arith.constant 0 : i32
    %c0_i32_1 = arith.constant 0 : i32
    return %c0_i32, %c0_i32_0 : i32, i32
  }
  func.func @transform_4(%arg0: i32) -> (i32, i32) {
    %c0_i32 = arith.constant 0 : i32
    %c0_i32_0 = arith.constant 0 : i32
    %c0_i32_1 = arith.constant 0 : i32
    return %c0_i32, %c0_i32_0 : i32, i32
  }
  func.func @transform_5(%arg0: i32) -> (i32, i32) {
    %c0_i32 = arith.constant 0 : i32
    %c0_i32_0 = arith.constant 0 : i32
    return %arg0, %c0_i32 : i32, i32
  }
}

</mosaic_0001>

<bundles_post_ra>
// kernel: tpu_custom_call.1
= control target key start
LH: loop header
LB: loop body
LE: loop exit
PB: predicated region body
PF: predicated region fallthrough
CT: control target
= control target key end

     0   :  { %10 = vsyncpa [#allocation3], 0  ;;  %s766_s0 = inlined_call_operand.vmem [shape: f32[32,16], index: 0, kind: input, shape index: {}]   ;;  %s767_s1 = inlined_call_operand.vmem [shape: f32[16,32], index: 1, kind: input, shape index: {}]   ;;  %s768_s2 = inlined_call_operand.vmem [shape: f32[1,32], index: 2, kind: input, shape index: {}]   ;;  %s769_s3 = inlined_call_operand.vmem [shape: f32[32,128], index: 3, kind: input, shape index: {}]   ;;  %s770_s4 = inlined_call_operand.vmem [shape: f32[1,128], index: 4, kind: input, shape index: {}]   ;;  %s771_s5 = inlined_call_operand.hbm [shape: f32[32,128], index: 5, kind: output, shape index: {}]  }
   0x1   :  { %12 = vsyncpa [#allocation3 + $0x1], 0  ;;  %s649_s18 = smov 0   ;;  %s651_s19 = smov 0  }
   0x2   :  { %s653_s20 = smov 0   ;;  %s655_s21 = smov 0  }
   0x3 LB: > { %s670_s22 = sadd.s32 4294967295, %s614_s21   ;;  %s469_s23 = sadd.s32 4294967294, %s614_s21   ;;  %s614_s21 = sphi %s655_s21, %s777_s21   ;;  %s610_s20 = sphi %s653_s20, %s776_s20   ;;  %s606_s19 = sphi %s651_s19, %s775_s19   ;;  %s602_s18 = sphi %s649_s18, %s774_s18  }
   0x4   : > { %s674_s24 = sadd.s32 1, %s614_s21   ;;  %s135_s25 = sadd.s32 1, %s610_s20 }
   0x5   : > { %s132_s26 = ssub.s32 %s614_s21, %s674_s24  ;;  %p145_p0 = scmp.ne.s32.totalorder %s610_s20, %s606_s19 }
   0x6   : > { %p133_p1 = scmp.eq.s32.totalorder %s132_s26, 0  ;;  %p146_p2 = scmp.eq.s32.totalorder %s670_s22, 3 }
   0x7   : > { %p151_p3 = scmp.ne.s32.totalorder %s606_s19, %s602_s18  ;;  %p152_p4 = scmp.eq.s32.totalorder %s469_s23, 3 }
   0x8   : > { %s685_s27 = scalar_select %p133_p1, %s610_s20, %s135_s25  }
   0x9   : > { %p687_p5 = por %p146_p2, %p145_p0  ;;  %p691_p6 = por %p152_p4, %p151_p3 }
   0xa   : > { %p472_p7 = scmp.ge.s32.totalorder %s614_s21, 1  ;;  %p189_p8 = scmp.lt.s32.totalorder %s614_s21, 5 }
   0xc   : > { %p190_p9 = pnand %p472_p7, %p189_p8 }
   0xd   : > { %p216_p10 = scmp.lt.s32.totalorder (!%p190_p9), %s670_s22, 3  ;;  %s213_s10 = sand.u32 (!%p190_p9), 1, %s606_s19  }
   0xe   : > { %193 = sbr.rel (%p190_p9) target bundleno = 463 (0x1cf), region = 40  ;;  %s397_s23 = scalar_lea.sflag (!%p190_p9), [#allocation3], %s213_s10 }
   0xf   : > { %s618_s26 = smov (!%p190_p9), [#allocation2]  }
  0x10   : > { %s558_s30 = sshll.u32 (!%p190_p9), %s618_s26, 4  ;;  %s559_s30 = int_to_ptr.vmem [resolvable:$false] %s558_s30 }
  0x13   : > { %v222_v0 = vld [vmem:[%s767_s1 + $0x8] sm:$0xff]  ;;  %v616_v1 = vmov 0.0   ;;  %v221_v2 = vld [vmem:[%s767_s1] sm:$0xff]  ;;  %vm617_vm0 = vmmov 0   ;;  %v308_v3 = vld [vmem:[%s769_s3 + $0x18] sm:$0xff]  ;;  %s217_s11 = scalar_select %p216_p10, %s670_s22, 3 }
  0x14   : > { %491 = vmatprep.subr.mxu0 %v616_v1  ;;  %495 = vmatprep.mubr.msk.f32.mxu0 %vm617_vm0, %v616_v1  ;;  %vm230_vm1 = vcmask 130048   ;;  %v307_v5 = vld [vmem:[%s769_s3 + $0x10] sm:$0xff]  ;;  %v306_v6 = vld [vmem:[%s769_s3 + $0x8] sm:$0xff]  ;;  %v305_v7 = vld [vmem:[%s769_s3] sm:$0xff]  ;;  %vm316_vm2 = vcmask 261120  }
  0x15   : > { %492 = vmatpush3.msra.mxu0 %v222_v0  ;;  %498 = vmatprep.subr.mxu1 %v616_v1  ;;  %s474_s12 = sshll.u32 %s217_s11, 3  ;;  %v475_v8 = vld [vmem:[%s768_s2] ss:$0 sm:$0xff]  ;;  %s473_s11 = sshll.u32 %s213_s10, 3 }
  0x16   : > { %493 = vmatprep.subr.mxu0 %v616_v1  ;;  %499 = vmatpush3.msra.mxu1 %v308_v3  ;;  %s219_s15 = scalar_lea.vmem %s766_s0, %s474_s12  ;;  %v477_v13 = vld [vmem:[%s770_s4] ss:$0 sm:$0xff]  ;;  %s480_s12 = sshll.u32 %s670_s22, 7 }
  0x17   : > { %494 = vmatpush3.msra.mxu0 %v221_v2  ;;  %500 = vmatprep.subr.mxu1 %v616_v1  ;;  %v220_v4 = vld [vmem:[%s219_s15] sm:$0xff]  ;;  %s215_s13 = scalar_lea.vmem [#allocation2], %s473_s11  ;;  %s731_s17 = scalar_lea.hbm %s771_s5, %s480_s12 }
  0x18   : > { %506 = vmatprep.mubr.msk.f32.mxu1 %vm617_vm0, %v616_v1  ;;  %496 = vmatmul.mubr.msk.f32.vlgmr.msra.gmra.mxu0 %vm230_vm1, %v220_v4  ;;  %s410_s14 = sshll.u32 %s215_s13, 4  ;;  %s560_s22 = scalar_lea.vmem %s559_s30, 256  ;;  %s411_s14 = int_to_ptr.vmem [resolvable:$true] %s410_s14 }
  0x19   : > { %501 = vmatpush3.msra.mxu1 %v307_v5  ;;  %s554_s25 = scalar_lea.vmem %s411_s14, 128  ;;  %p561_p0 = scmp.lt.s32.totalorder %s411_s14, %s559_s30 }
  0x1a   : > { %502 = vmatprep.subr.mxu1 %v616_v1  ;;  %p555_p11 = scmp.ne.s32.totalorder %s411_s14, %s554_s25  ;;  %p562_p1 = scmp.lt.s32.totalorder %s560_s22, %s554_s25 }
  0x1b   : > { %503 = vmatpush3.msra.mxu1 %v306_v6 }
  0x1c   : > { %504 = vmatprep.subr.mxu1 %v616_v1  ;;  %p556_p12 = pnand %p555_p11, %p687_p5  ;;  %p563_p2 = por %p562_p1, %p561_p0 }
  0x1d   : > { %505 = vmatpush3.msra.mxu1 %v305_v7 }
  0x1e   : > { %p557_p13 = pneg %p556_p12 }
  0x20   : > { %p564_p3 = pnand %p563_p2, %p557_p13 }
  0xd8   : > { %v300_v9 = vpop.f32.mrf.mxu0 }
  0xd9   : > { %v301_v10 = vadd.f32 %v475_v8, %v300_v9 }
  0xda   : > { %v497_v11 = vpop.f32.mrf.mxu0 }
  0xdb   : > { %v304_v12 = vmax.f32 %v301_v10, 0.0 }
  0xdd   : > { %507 = vmatmul.mubr.msk.f32.vlgmr.msra.gmra.mxu1 %vm316_vm2, %v304_v12 }
 0x19d   : > { %v386_v14 = vpop.f32.mrf.mxu1 }
 0x19e   : > { %v387_v15 = vadd.f32 %v477_v13, %v386_v14 }
 0x19f   : > { %v508_v16 = vpop.f32.mrf.mxu1 }
 0x1a0   : > { %v390_v17 = vsub.f32 0.0, %v387_v15 }
 0x1a2   : > { %v391_v18 = vmul.f32 1.442695, %v390_v17 }
 0x1a4   : > { %550 = vpow2.f32 %v391_v18 }
 0x1b1   : > { %v551_v19 = vpop.eup %550 }
 0x1b2   : > { %v393_v20 = vadd.f32 1.0, %v551_v19 }
 0x1b4   : > { %552 = vrcp.f32 %v393_v20 }
 0x1c1   : > { %v553_v21 = vpop.eup %552 }
 0x1c2   : > { %395 = vst [vmem:[%s215_s13] sm:$0xff] %v553_v21 }
 0x1c3   : > { %567 = shalt.err (!%p564_p3)
}
 0x1c4   : > { %s568_s6 = scalar_lea.hbm %s731_s17, 128  ;;  %s572_s9 = scalar_lea.hbm %s771_s5, 512 }
 0x1c5   : > { %p569_p4 = scmp.ne.s32.totalorder %s731_s17, %s568_s6  ;;  %p573_p9 = scmp.lt.s32.totalorder %s731_s17, %s771_s5 }
 0x1c6   : > { %p574_p10 = scmp.lt.s32.totalorder %s572_s9, %s568_s6 }
 0x1c7   : > { %p570_p7 = pnand %p569_p4, %p687_p5 }
 0x1c8   : > { %p575_p11 = por %p574_p10, %p573_p9 }
 0x1c9   : > { %p571_p8 = pneg %p570_p7 }
 0x1cb   : > { %p576_p12 = pnand %p575_p11, %p571_p8 }
 0x1cd   : > { %579 = shalt.err (!%p576_p12)
}
 0x1ce   : > { %509 = dma.vmem_to_hbm [thread:$0]  (%p687_p5), %s411_s14, 128, %s731_s17, %s397_s23  }
 0x1cf PF: > { %p515_p13 = scmp.ge.s32.totalorder %s614_s21, 2  ;;  %s422_s12 = sand.u32 1, %s602_s18  }
 0x1d0   : > { %s423_s13 = scalar_lea.sflag [#allocation3], %s422_s12 }
 0x1d1   : > { %p512_p0 = pnand %p515_p13, %p691_p6 }
 0x1d3   : > { %p513_p1 = pneg %p512_p0 }
 0x1d5   : > { %597 = dma.done.wait (%p513_p1), %s423_s13, 128  }
 0x1d6   : > { %599 = vsyncadd (%p513_p1), %s423_s13, 4294967168  ;;  %p15_p2 = scmp.ge.s32.totalorder %s674_s24, 6   ;;  %s774_s18 = smov %s606_s19 }
 0x1d7   : > { %s775_s19 = smov %s610_s20  ;;  %s776_s20 = smov %s685_s27 }
 0x1d8   : > { %s777_s21 = smov %s674_s24  ;;  %17 = sbr.rel (!%p15_p2) target bundleno = 3 (0x3), region = 75 }
 0x1dd   :  { %428 = vsyncpa [#allocation3], 1 }
 0x1de   :  { %430 = vsyncpa [#allocation3 + $0x1], 1 }

</bundles_post_ra>
